<compile_context>
chip_gen: v6e
topology: v6e:2x2x1
jax: 0.10.0
libtpu: 0.0.40
codegen_flags: <defaults>
</compile_context>

<pallas_src>
import functools
import math

import jax
import jax.numpy as jnp
from jax.experimental import pallas as pl
from jax.experimental.pallas import tpu as pltpu

HIDDEN = 64
WIDTH = 2 * HIDDEN  # 128: critic lanes [0:64), actor lanes [64:128)


def _leaky_relu(v, alpha=0.01):
    # single VPU max instead of compare+select
    return jnp.maximum(v, alpha * v)


def a2c_kernel(x_ref, p_ref, out_ref, *, hw_pad, outputs):
    x = x_ref[...]                              # (1, hw_pad) f32

    r1 = hw_pad                                 # end of W1 rows
    r2 = hw_pad + WIDTH                         # end of W2 rows
    r3 = hw_pad + 2 * WIDTH                     # start of bias rows (8-aligned)

    w1 = p_ref[0:r1, :]                         # (hw_pad, 128) packed [Wc1 | Wa1]
    w2 = p_ref[r1:r2, :]                        # (128, 128) block-diag
    wh = p_ref[r2:r3, :]                        # (128, 128) block-diag head
    bias = p_ref[r3:r3 + 8, :]                  # (8, 128) aligned bias slab
    b1 = bias[0:1, :]                           # (1, 128) packed [bc1 | ba1]
    b2 = bias[1:2, :]                           # (1, 128) packed [bc2 | ba2]
    bh = bias[2:3, :]                           # (1, 128) packed [bco, bao, 0...]

    # layer 1: fused critic||actor, one MXU push
    h1 = _leaky_relu(jnp.dot(x, w1, preferred_element_type=jnp.float32) + b1)
    # layer 2: block-diagonal (critic block | actor block), one MXU push
    h2 = _leaky_relu(jnp.dot(h1, w2, preferred_element_type=jnp.float32) + b2)
    # head: block-diagonal -> lane 0 = value, lanes 1..outputs = logits
    head = jnp.dot(h2, wh, preferred_element_type=jnp.float32) + bh

    lane = jax.lax.broadcasted_iota(jnp.int32, head.shape, 1)   # (1, 128)
    is_logit = jnp.logical_and(lane >= 1, lane < 1 + outputs)

    masked = jnp.where(is_logit, head, -jnp.inf)
    m = jnp.max(masked, axis=-1, keepdims=True)
    e = jnp.where(is_logit, jnp.exp(masked - m), 0.0)
    denom = jnp.sum(e, axis=-1, keepdims=True)
    probs = e * pl.reciprocal(denom, approx=False)

    # single lane-dense, unmasked write: [value, probs..., zeros]
    out_ref[...] = jnp.where(lane == 0, head, probs)


def init_params(h, w, outputs, key):
    """Per-layer params matching the torch module (weights stored (in, out))."""
    hw = h * w
    shapes = {
        "wc1": (hw, HIDDEN), "bc1": (HIDDEN,),
        "wc2": (HIDDEN, HIDDEN), "bc2": (HIDDEN,),
        "wa1": (hw, HIDDEN), "ba1": (HIDDEN,),
        "wa2": (HIDDEN, HIDDEN), "ba2": (HIDDEN,),
        "wco": (HIDDEN, 1), "bco": (1,),
        "wao": (HIDDEN, outputs), "bao": (outputs,),
    }
    fan_in = {
        "wc1": hw, "bc1": hw, "wc2": HIDDEN, "bc2": HIDDEN,
        "wa1": hw, "ba1": hw, "wa2": HIDDEN, "ba2": HIDDEN,
        "wco": HIDDEN, "bco": HIDDEN, "wao": HIDDEN, "bao": HIDDEN,
    }
    keys = jax.random.split(key, len(shapes))
    raw = {}
    for (name, shape), k in zip(shapes.items(), keys):
        bound = 1.0 / math.sqrt(fan_in[name])
        raw[name] = jax.random.uniform(k, shape, jnp.float32, -bound, bound)
    return raw


def pack_params(raw, h, w, outputs):
    """Pack 12 per-layer arrays into ONE lane-dense slab (done once, host side)."""
    hw = h * w
    hw_pad = ((hw + 127) // 128) * 128          # lane/sublane-aligned input width

    # layer 1: concat critic/actor weights along out dim, zero-pad input rows
    w1 = jnp.zeros((hw_pad, WIDTH), jnp.float32)
    w1 = w1.at[:hw, :HIDDEN].set(raw["wc1"]).at[:hw, HIDDEN:].set(raw["wa1"])
    # layer 2: block diagonal (128, 128)
    w2 = jnp.zeros((WIDTH, WIDTH), jnp.float32)
    w2 = w2.at[:HIDDEN, :HIDDEN].set(raw["wc2"]).at[HIDDEN:, HIDDEN:].set(raw["wa2"])
    # head: block diagonal, lane 0 = critic value, lanes 1..outputs = actor logits
    wh = jnp.zeros((WIDTH, WIDTH), jnp.float32)
    wh = wh.at[:HIDDEN, 0:1].set(raw["wco"]).at[HIDDEN:, 1:1 + outputs].set(raw["wao"])
    # bias slab (8, 128): row0=layer1, row1=layer2, row2=head, rest zero
    bias = jnp.zeros((8, WIDTH), jnp.float32)
    bias = bias.at[0, :HIDDEN].set(raw["bc1"]).at[0, HIDDEN:].set(raw["ba1"])
    bias = bias.at[1, :HIDDEN].set(raw["bc2"]).at[1, HIDDEN:].set(raw["ba2"])
    bias = bias.at[2, 0].set(raw["bco"][0]).at[2, 1:1 + outputs].set(raw["bao"])

    params = jnp.concatenate([w1, w2, wh, bias], axis=0)  # (hw_pad + 264, 128)
    return params, hw_pad


@functools.partial(jax.jit, static_argnames=("hw_pad", "outputs"))
def a2c_forward(x, params, hw_pad, outputs):
    """x: (h, w) float32 -> (value (1,), prob (outputs,))"""
    hw = x.shape[0] * x.shape[1]
    x_flat = jnp.zeros((1, hw_pad), jnp.float32)
    x_flat = x_flat.at[0, :hw].set(x.reshape(-1).astype(jnp.float32))

    vmem = pl.BlockSpec(memory_space=pltpu.MemorySpace.VMEM)
    out = pl.pallas_call(
        functools.partial(a2c_kernel, hw_pad=hw_pad, outputs=outputs),
        out_shape=jax.ShapeDtypeStruct((1, WIDTH), jnp.float32),
        in_specs=[vmem, vmem],
        out_specs=vmem,
    )(x_flat, params)

    value = out[0, 0:1]                 # (1,)
    prob = out[0, 1:1 + outputs]        # (outputs,)
    return value, prob


def reference_forward(x, raw, outputs):
    """Pure-JAX reference of the torch forward."""
    xf = x.reshape(1, -1).astype(jnp.float32)
    lk = lambda v: jnp.where(v > 0, v, 0.01 * v)
    c = lk(xf @ raw["wc1"] + raw["bc1"])
    c = lk(c @ raw["wc2"] + raw["bc2"])
    a = lk(xf @ raw["wa1"] + raw["ba1"])
    a = lk(a @ raw["wa2"] + raw["ba2"])
    value = c @ raw["wco"] + raw["bco"]
    logits = a @ raw["wao"] + raw["bao"]
    prob = jax.nn.softmax(logits, axis=-1)
    return value.reshape(1), prob.reshape(outputs)


if __name__ == "__main__":
    h, w, outputs = 16, 16, 4

    key = jax.random.PRNGKey(0)
    k_params, k_x = jax.random.split(key)
    raw = init_params(h, w, outputs, k_params)
    params, hw_pad = pack_params(raw, h, w, outputs)
    x = jax.random.normal(k_x, (h, w), jnp.float32)

    value, prob = a2c_forward(x, params, hw_pad, outputs)
    value, prob = jax.block_until_ready((value, prob))

    v_ref, p_ref = reference_forward(x, raw, outputs)
    assert jnp.allclose(value, v_ref, atol=1e-5, rtol=1e-5), (value, v_ref)
    assert jnp.allclose(prob, p_ref, atol=1e-5, rtol=1e-5), (prob, p_ref)
    assert jnp.allclose(jnp.sum(prob), 1.0, atol=1e-5)

    print("KERNEL_OK")
</pallas_src>

<mosaic_0001>
module attributes {stable_mosaic.version = 11 : i64} {
  func.func @a2c_kernel(%arg0: memref<1x256xf32, #tpu.memory_space<vmem>>, %arg1: memref<520x128xf32, #tpu.memory_space<vmem>>, %arg2: memref<1x128xf32, #tpu.memory_space<vmem>>) attributes {dimension_semantics = [], scalar_prefetch = 0 : i64, scratch_operands = 0 : i64, tpu.core_type = #tpu.core_type<tc>} {
    %c0 = arith.constant 0 : index
    %c0_0 = arith.constant 0 : index
    %0 = vector.load %arg0[%c0, %c0_0] : memref<1x256xf32, #tpu.memory_space<vmem>>, vector<1x256xf32>
    %c0_1 = arith.constant 0 : index
    %c0_2 = arith.constant 0 : index
    %1 = vector.load %arg1[%c0_1, %c0_2] : memref<520x128xf32, #tpu.memory_space<vmem>>, vector<256x128xf32>
    %c256 = arith.constant 256 : index
    %c0_3 = arith.constant 0 : index
    %2 = vector.load %arg1[%c256, %c0_3] : memref<520x128xf32, #tpu.memory_space<vmem>>, vector<128x128xf32>
    %c384 = arith.constant 384 : index
    %c0_4 = arith.constant 0 : index
    %3 = vector.load %arg1[%c384, %c0_4] : memref<520x128xf32, #tpu.memory_space<vmem>>, vector<128x128xf32>
    %c512 = arith.constant 512 : index
    %c0_5 = arith.constant 0 : index
    %4 = vector.load %arg1[%c512, %c0_5] : memref<520x128xf32, #tpu.memory_space<vmem>>, vector<8x128xf32>
    %5 = vector.extract_strided_slice %4 {offsets = [0, 0], sizes = [1, 128], strides = [1, 1]} : vector<8x128xf32> to vector<1x128xf32>
    %6 = vector.extract_strided_slice %4 {offsets = [1, 0], sizes = [1, 128], strides = [1, 1]} : vector<8x128xf32> to vector<1x128xf32>
    %7 = vector.extract_strided_slice %4 {offsets = [2, 0], sizes = [1, 128], strides = [1, 1]} : vector<8x128xf32> to vector<1x128xf32>
    %cst = arith.constant dense<0.000000e+00> : vector<1x128xf32>
    %8 = tpu.matmul %0, %1, %cst {dimension_numbers = #tpu.dot_dimension_numbers<[1], [0], [0], [1], [0, 0, 1, 1], [], []>} : vector<1x256xf32>, vector<256x128xf32>, vector<1x128xf32> -> vector<1x128xf32>
    %9 = arith.addf %8, %5 : vector<1x128xf32>
    %cst_6 = arith.constant 0.00999999977 : f32
    %10 = vector.broadcast %cst_6 : f32 to vector<1x128xf32>
    %11 = arith.mulf %10, %9 : vector<1x128xf32>
    %12 = arith.maximumf %9, %11 : vector<1x128xf32>
    %cst_7 = arith.constant dense<0.000000e+00> : vector<1x128xf32>
    %13 = tpu.matmul %12, %2, %cst_7 {dimension_numbers = #tpu.dot_dimension_numbers<[1], [0], [0], [1], [0, 0, 1, 1], [], []>} : vector<1x128xf32>, vector<128x128xf32>, vector<1x128xf32> -> vector<1x128xf32>
    %14 = arith.addf %13, %6 : vector<1x128xf32>
    %cst_8 = arith.constant 0.00999999977 : f32
    %15 = vector.broadcast %cst_8 : f32 to vector<1x128xf32>
    %16 = arith.mulf %15, %14 : vector<1x128xf32>
    %17 = arith.maximumf %14, %16 : vector<1x128xf32>
    %cst_9 = arith.constant dense<0.000000e+00> : vector<1x128xf32>
    %18 = tpu.matmul %17, %3, %cst_9 {dimension_numbers = #tpu.dot_dimension_numbers<[1], [0], [0], [1], [0, 0, 1, 1], [], []>} : vector<1x128xf32>, vector<128x128xf32>, vector<1x128xf32> -> vector<1x128xf32>
    %19 = arith.addf %18, %7 : vector<1x128xf32>
    %20 = tpu.iota {dimensions = array<i32: 1>} : vector<1x128xi32>
    %c1_i32 = arith.constant 1 : i32
    %21 = vector.broadcast %c1_i32 : i32 to vector<1x128xi32>
    %22 = arith.cmpi sge, %20, %21 : vector<1x128xi32>
    %c5_i32 = arith.constant 5 : i32
    %23 = vector.broadcast %c5_i32 : i32 to vector<1x128xi32>
    %24 = arith.cmpi slt, %20, %23 : vector<1x128xi32>
    %25 = arith.andi %22, %24 : vector<1x128xi1>
    %cst_10 = arith.constant 0xFF800000 : f32
    %26 = vector.broadcast %cst_10 : f32 to vector<1x128xf32>
    %27 = arith.select %25, %19, %26 : vector<1x128xi1>, vector<1x128xf32>
    %cst_11 = arith.constant dense<0xFF800000> : vector<1xf32>
    %28 = vector.multi_reduction <maximumf>, %27, %cst_11 [1] : vector<1x128xf32> to vector<1xf32>
    %29 = vector.shape_cast %28 : vector<1xf32> to vector<1x1xf32>
    %30 = vector.broadcast %29 : vector<1x1xf32> to vector<1x128xf32>
    %31 = arith.subf %27, %30 : vector<1x128xf32>
    %32 = math.exp %31 : vector<1x128xf32>
    %cst_12 = arith.constant 0.000000e+00 : f32
    %33 = vector.broadcast %cst_12 : f32 to vector<1x128xf32>
    %34 = arith.select %25, %32, %33 : vector<1x128xi1>, vector<1x128xf32>
    %cst_13 = arith.constant dense<0.000000e+00> : vector<1xf32>
    %35 = vector.multi_reduction <add>, %34, %cst_13 [1] : vector<1x128xf32> to vector<1xf32>
    %36 = vector.shape_cast %35 : vector<1xf32> to vector<1x1xf32>
    %37 = tpu.reciprocal %36 : vector<1x1xf32> -> vector<1x1xf32>
    %38 = vector.broadcast %37 : vector<1x1xf32> to vector<1x128xf32>
    %39 = arith.mulf %34, %38 : vector<1x128xf32>
    %c0_i32 = arith.constant 0 : i32
    %40 = vector.broadcast %c0_i32 : i32 to vector<1x128xi32>
    %41 = arith.cmpi eq, %20, %40 : vector<1x128xi32>
    %42 = arith.select %41, %19, %39 : vector<1x128xi1>, vector<1x128xf32>
    %c0_14 = arith.constant 0 : index
    %c0_15 = arith.constant 0 : index
    %43 = vector.load %arg2[%c0_14, %c0_15] : memref<1x128xf32, #tpu.memory_space<vmem>>, vector<1x128xf32>
    tpu.vector_store %arg2[%c0_14, %c0_15], %42 {strides = array<i32>} : memref<1x128xf32, #tpu.memory_space<vmem>>, vector<1x128xf32>,
    return
  }
}

</mosaic_0001>

<bundles_post_ra>
// kernel: a2c_forward.1
= control target key start
LH: loop header
LB: loop body
LE: loop exit
PB: predicated region body
PF: predicated region fallthrough
CT: control target
= control target key end

     0   :  { %7 = vsyncpa [#allocation3], 0  ;;  %s518_s9 = smov [#allocation2]   ;;  %s591_s0 = inlined_call_operand.vmem [shape: f32[1,256], index: 0, kind: input, shape index: {}]   ;;  %s592_s1 = inlined_call_operand.hbm [shape: f32[520,128], index: 1, kind: input, shape index: {}]   ;;  %s593_s2 = inlined_call_operand.vmem [shape: f32[1,128], index: 2, kind: output, shape index: {}]  }
   0x1   :  { %s15_s10 = sshll.u32 %s518_s9, 4  ;;  %s16_s10 = int_to_ptr.vmem [resolvable:$true] %s15_s10 }
   0x2   :  { %s504_s11 = scalar_lea.vmem %s16_s10, 8320  ;;  %p509_p1 = scmp.lt.s32.totalorder %s16_s10, %s16_s10 }
   0x3   :  { %p505_p0 = scmp.ne.s32.totalorder %s16_s10, %s504_s11  ;;  %p510_p2 = scmp.lt.s32.totalorder %s504_s11, %s504_s11 }
   0x5   :  { %p511_p3 = por %p510_p2, %p509_p1 }
   0x7   :  { %p512_p4 = pnand %p511_p3, %p505_p0 }
   0x9   :  { %515 = shalt.err (!%p512_p4)
}
   0xa   :  { %s519_s12 = smov 128   ;;  %s520_s13 = smov 8  }
   0xb   :  { %21 = dma.hbm_to_vmem [thread:$0]  %s592_s1, 8320, %s16_s10, [#allocation3], %s519_s12, %s519_s12, %s520_s13  }
   0xc   :  { %516 = dma.done.wait [#allocation3], 8320  }
   0xd   :  { %517 = vsyncadd [#allocation3], 4294958976  ;;  %v521_v0 = vmov 0.0   ;;  %v92_v1 = vlaneseq  ;;  %v57_v2 = vld [vmem:[#allocation2 + $0xf8] sm:$0xff]  ;;  %v56_v4 = vld [vmem:[#allocation2 + $0xf0] sm:$0xff]  ;;  %vm522_vm0 = vmmov 0  }
   0xe   :  { %417 = vmatprep.subr.mxu1 %v521_v0  ;;  %v41_v3 = vld [vmem:[#allocation2 + $0x78] sm:$0xff]  ;;  %348 = vmatprep.subr.mxu0 %v57_v2  ;;  %v40_v5 = vld [vmem:[#allocation2 + $0x70] sm:$0xff]  ;;  %v55_v6 = vld [vmem:[#allocation2 + $0xe8] sm:$0xff]  ;;  %vm327_vm4 = vcmask 1040384  }
   0xf   :  { %349 = vmatpush3.msra.mxu0 %v41_v3  ;;  %v39_v7 = vld [vmem:[#allocation2 + $0x68] sm:$0xff]  ;;  %v543_v8 = vshrl.u32 %v92_v1, 7  ;;  %v54_v9 = vld [vmem:[#allocation2 + $0xe0] sm:$0xff]  ;;  %v53_v11 = vld [vmem:[#allocation2 + $0xd8] sm:$0xff]  ;;  %449 = vmatprep.mubr.msk.f32.mxu1 %vm522_vm0, %v521_v0 }
  0x10   :  { %350 = vmatprep.subr.mxu0 %v56_v4  ;;  %v38_v10 = vld [vmem:[#allocation2 + $0x60] sm:$0xff]  ;;  %v37_v12 = vld [vmem:[#allocation2 + $0x58] sm:$0xff]  ;;  %v52_v14 = vld [vmem:[#allocation2 + $0xd0] sm:$0xff] }
  0x11   :  { %351 = vmatpush3.msra.mxu0 %v40_v5  ;;  %v98_v13 = vsub.s32 1, %v543_v8  ;;  %v36_v15 = vld [vmem:[#allocation2 + $0x50] sm:$0xff]  ;;  %v51_v16 = vld [vmem:[#allocation2 + $0xc8] sm:$0xff]  ;;  %v549_v17 = vld [vmem:[%s591_s0] sm:$0x3]  ;;  %v94_v42 = vsub.s32 0, %v543_v8 }
  0x12   :  { %352 = vmatprep.subr.mxu0 %v55_v6  ;;  %v35_v18 = vld [vmem:[#allocation2 + $0x48] sm:$0xff]  ;;  %v73_v20 = vld [vmem:[#allocation2 + $0x178] sm:$0xff]  ;;  %v50_v21 = vld [vmem:[#allocation2 + $0xc0] sm:$0xff] }
  0x13   :  { %353 = vmatpush3.msra.mxu0 %v39_v7  ;;  %v99_v19 = vrot.slane %v549_v17, %v98_v13  ;;  %418 = vmatpush3.msra.mxu1 %v73_v20  ;;  %v72_v22 = vld [vmem:[#allocation2 + $0x170] sm:$0xff]  ;;  %v34_v23 = vld [vmem:[#allocation2 + $0x40] sm:$0xff]  ;;  %v49_v24 = vld [vmem:[#allocation2 + $0xb8] sm:$0xff]  ;;  %v95_v49 = vrot.slane %v549_v17, %v94_v42 }
  0x14   :  { %354 = vmatprep.subr.mxu0 %v54_v9  ;;  %419 = vmatprep.subr.mxu1 %v521_v0  ;;  %v71_v25 = vld [vmem:[#allocation2 + $0x168] sm:$0xff]  ;;  %v33_v26 = vld [vmem:[#allocation2 + $0x38] sm:$0xff]  ;;  %v48_v27 = vld [vmem:[#allocation2 + $0xb0] sm:$0xff] }
  0x15   :  { %355 = vmatpush3.msra.mxu0 %v38_v10  ;;  %166 = vmatprep.mubr.f32.mxu0 %v99_v19  ;;  %v70_v28 = vld [vmem:[#allocation2 + $0x160] sm:$0xff]  ;;  %v32_v29 = vld [vmem:[#allocation2 + $0x30] sm:$0xff]  ;;  %v47_v30 = vld [vmem:[#allocation2 + $0xa8] sm:$0xff] }
  0x16   :  { %356 = vmatprep.subr.mxu0 %v53_v11  ;;  %420 = vmatpush3.msra.mxu1 %v72_v22  ;;  %v69_v31 = vld [vmem:[#allocation2 + $0x158] sm:$0xff]  ;;  %v31_v32 = vld [vmem:[#allocation2 + $0x28] sm:$0xff]  ;;  %v46_v33 = vld [vmem:[#allocation2 + $0xa0] sm:$0xff] }
  0x17   :  { %357 = vmatpush3.msra.mxu0 %v37_v12  ;;  %421 = vmatprep.subr.mxu1 %v521_v0  ;;  %v68_v34 = vld [vmem:[#allocation2 + $0x150] sm:$0xff]  ;;  %v30_v35 = vld [vmem:[#allocation2 + $0x20] sm:$0xff]  ;;  %v45_v36 = vld [vmem:[#allocation2 + $0x98] sm:$0xff] }
  0x18   :  { %358 = vmatprep.subr.mxu0 %v52_v14  ;;  %422 = vmatpush3.msra.mxu1 %v71_v25  ;;  %v67_v37 = vld [vmem:[#allocation2 + $0x148] sm:$0xff]  ;;  %v29_v38 = vld [vmem:[#allocation2 + $0x18] sm:$0xff]  ;;  %v44_v39 = vld [vmem:[#allocation2 + $0x90] sm:$0xff] }
  0x19   :  { %359 = vmatpush3.msra.mxu0 %v36_v15  ;;  %423 = vmatprep.subr.mxu1 %v521_v0  ;;  %v66_v40 = vld [vmem:[#allocation2 + $0x140] sm:$0xff]  ;;  %v28_v41 = vld [vmem:[#allocation2 + $0x10] sm:$0xff]  ;;  %v43_v43 = vld [vmem:[#allocation2 + $0x88] sm:$0xff] }
  0x1a   :  { %360 = vmatprep.subr.mxu0 %v51_v16  ;;  %424 = vmatpush3.msra.mxu1 %v70_v28  ;;  %v65_v44 = vld [vmem:[#allocation2 + $0x138] sm:$0xff]  ;;  %v27_v45 = vld [vmem:[#allocation2 + $0x8] sm:$0xff]  ;;  %v42_v46 = vld [vmem:[#allocation2 + $0x80] sm:$0xff] }
  0x1b   :  { %361 = vmatpush3.msra.mxu0 %v35_v18  ;;  %425 = vmatprep.subr.mxu1 %v521_v0  ;;  %v64_v47 = vld [vmem:[#allocation2 + $0x130] sm:$0xff]  ;;  %v26_v48 = vld [vmem:[#allocation2] sm:$0xff]  ;;  %v63_v50 = vld [vmem:[#allocation2 + $0x128] sm:$0xff] }
  0x1c   :  { %362 = vmatprep.subr.mxu0 %v50_v21  ;;  %426 = vmatpush3.msra.mxu1 %v69_v31  ;;  %v62_v51 = vld [vmem:[#allocation2 + $0x120] sm:$0xff]  ;;  %v61_v52 = vld [vmem:[#allocation2 + $0x118] sm:$0xff]  ;;  %v60_v53 = vld [vmem:[#allocation2 + $0x110] sm:$0xff] }
  0x1d   :  { %363 = vmatpush3.msra.mxu0 %v34_v23  ;;  %427 = vmatprep.subr.mxu1 %v521_v0  ;;  %v59_v54 = vld [vmem:[#allocation2 + $0x108] sm:$0xff]  ;;  %v58_v55 = vld [vmem:[#allocation2 + $0x100] sm:$0xff]  ;;  %v89_v56 = vld [vmem:[#allocation2 + $0x1f8] sm:$0xff]  ;;  %v322_v23 = vand.u32 127, %v92_v1 }
  0x1e   :  { %364 = vmatprep.subr.mxu0 %v49_v24  ;;  %428 = vmatpush3.msra.mxu1 %v68_v34  ;;  %v88_v57 = vld [vmem:[#allocation2 + $0x1f0] sm:$0xff]  ;;  %v87_v58 = vld [vmem:[#allocation2 + $0x1e8] sm:$0xff]  ;;  %v86_v59 = vld [vmem:[#allocation2 + $0x1e0] sm:$0xff] }
  0x1f   :  { %365 = vmatpush3.msra.mxu0 %v33_v26  ;;  %429 = vmatprep.subr.mxu1 %v521_v0  ;;  %v85_v60 = vld [vmem:[#allocation2 + $0x1d8] sm:$0xff]  ;;  %v84_v61 = vld [vmem:[#allocation2 + $0x1d0] sm:$0xff]  ;;  %v83_v62 = vld [vmem:[#allocation2 + $0x1c8] sm:$0xff]  ;;  %vm323_vm1 = vcmp.ge.s32.totalorder %v322_v23, 1  ;;  %vm324_vm2 = vcmp.lt.s32.totalorder %v322_v23, 5  ;;  %vm340_vm5 = vcmp.eq.s32.totalorder %v322_v23, 0 }
  0x20   :  { %366 = vmatprep.subr.mxu0 %v48_v27  ;;  %430 = vmatpush3.msra.mxu1 %v67_v37  ;;  %v82_v63 = vld [vmem:[#allocation2 + $0x1c0] sm:$0xff]  ;;  %v81_v2 = vld [vmem:[#allocation2 + $0x1b8] sm:$0xff]  ;;  %v80_v3 = vld [vmem:[#allocation2 + $0x1b0] sm:$0xff] }
  0x21   :  { %367 = vmatpush3.msra.mxu0 %v32_v29  ;;  %431 = vmatprep.subr.mxu1 %v521_v0  ;;  %v79_v4 = vld [vmem:[#allocation2 + $0x1a8] sm:$0xff]  ;;  %v78_v5 = vld [vmem:[#allocation2 + $0x1a0] sm:$0xff]  ;;  %v77_v13 = vld [vmem:[#allocation2 + $0x198] sm:$0xff] }
  0x22   :  { %368 = vmatprep.subr.mxu0 %v47_v30  ;;  %432 = vmatpush3.msra.mxu1 %v66_v40  ;;  %v90_v7 = vld [vmem:[#allocation2 + $0x200] sm:$0xff]  ;;  %v76_v14 = vld [vmem:[#allocation2 + $0x190] sm:$0xff]  ;;  %v75_v15 = vld [vmem:[#allocation2 + $0x188] sm:$0xff] }
  0x23   :  { %369 = vmatpush3.msra.mxu0 %v31_v32  ;;  %433 = vmatprep.subr.mxu1 %v521_v0  ;;  %v74_v16 = vld [vmem:[#allocation2 + $0x180] sm:$0xff]  ;;  %v175_v17 = vrot.slane %v90_v7, 1  ;;  %v249_v24 = vrot.slane %v90_v7, 2  ;;  %vm325_vm3 = vmand %vm323_vm1, %vm324_vm2 }
  0x24   :  { %370 = vmatprep.subr.mxu0 %v46_v33  ;;  %434 = vmatpush3.msra.mxu1 %v65_v44 }
  0x25   :  { %371 = vmatpush3.msra.mxu0 %v30_v35  ;;  %435 = vmatprep.subr.mxu1 %v521_v0 }
  0x26   :  { %372 = vmatprep.subr.mxu0 %v45_v36  ;;  %436 = vmatpush3.msra.mxu1 %v64_v47 }
  0x27   :  { %373 = vmatpush3.msra.mxu0 %v29_v38  ;;  %437 = vmatprep.subr.mxu1 %v521_v0 }
  0x28   :  { %374 = vmatprep.subr.mxu0 %v44_v39  ;;  %438 = vmatpush3.msra.mxu1 %v63_v50 }
  0x29   :  { %375 = vmatpush3.msra.mxu0 %v28_v41  ;;  %439 = vmatprep.subr.mxu1 %v521_v0 }
  0x2a   :  { %376 = vmatprep.subr.mxu0 %v43_v43  ;;  %440 = vmatpush3.msra.mxu1 %v62_v51 }
  0x2b   :  { %377 = vmatpush3.msra.mxu0 %v27_v45  ;;  %441 = vmatprep.subr.mxu1 %v521_v0 }
  0x2c   :  { %378 = vmatprep.subr.mxu0 %v42_v46  ;;  %442 = vmatpush3.msra.mxu1 %v61_v52 }
  0x2d   :  { %379 = vmatpush3.msra.mxu0 %v26_v48  ;;  %443 = vmatprep.subr.mxu1 %v521_v0 }
  0x2e   :  { %167 = vmatmul.mubr.f32.vlgmr.msra.gmra.mxu0 %v95_v49  ;;  %452 = vmatprep.subr.mxu0 %v521_v0 }
  0x2f   :  { %444 = vmatpush3.msra.mxu1 %v60_v53  ;;  %484 = vmatprep.mubr.msk.f32.mxu0 %vm522_vm0, %v521_v0 }
  0x30   :  { %445 = vmatprep.subr.mxu1 %v521_v0  ;;  %453 = vmatpush3.msra.mxu0 %v89_v56 }
  0x31   :  { %446 = vmatpush3.msra.mxu1 %v59_v54  ;;  %454 = vmatprep.subr.mxu0 %v521_v0 }
  0x32   :  { %447 = vmatprep.subr.mxu1 %v521_v0  ;;  %455 = vmatpush3.msra.mxu0 %v88_v57 }
  0x33   :  { %448 = vmatpush3.msra.mxu1 %v58_v55  ;;  %456 = vmatprep.subr.mxu0 %v521_v0 }
  0x34   :  { %457 = vmatpush3.msra.mxu0 %v87_v58 }
  0x35   :  { %458 = vmatprep.subr.mxu0 %v521_v0 }
  0x36   :  { %459 = vmatpush3.msra.mxu0 %v86_v59 }
  0x37   :  { %460 = vmatprep.subr.mxu0 %v521_v0 }
  0x38   :  { %461 = vmatpush3.msra.mxu0 %v85_v60 }
  0x39   :  { %462 = vmatprep.subr.mxu0 %v521_v0 }
  0x3a   :  { %463 = vmatpush3.msra.mxu0 %v84_v61 }
  0x3b   :  { %464 = vmatprep.subr.mxu0 %v521_v0 }
  0x3c   :  { %465 = vmatpush3.msra.mxu0 %v83_v62 }
  0x3d   :  { %466 = vmatprep.subr.mxu0 %v521_v0 }
  0x3e   :  { %467 = vmatpush3.msra.mxu0 %v82_v63 }
  0x3f   :  { %468 = vmatprep.subr.mxu0 %v521_v0 }
  0x40   :  { %469 = vmatpush3.msra.mxu0 %v81_v2 }
  0x41   :  { %470 = vmatprep.subr.mxu0 %v521_v0 }
  0x42   :  { %471 = vmatpush3.msra.mxu0 %v80_v3 }
  0x43   :  { %472 = vmatprep.subr.mxu0 %v521_v0 }
  0x44   :  { %473 = vmatpush3.msra.mxu0 %v79_v4 }
  0x45   :  { %474 = vmatprep.subr.mxu0 %v521_v0 }
  0x46   :  { %475 = vmatpush3.msra.mxu0 %v78_v5 }
  0x47   :  { %476 = vmatprep.subr.mxu0 %v521_v0 }
  0x48   :  { %477 = vmatpush3.msra.mxu0 %v77_v13 }
  0x49   :  { %478 = vmatprep.subr.mxu0 %v521_v0 }
  0x4a   :  { %479 = vmatpush3.msra.mxu0 %v76_v14 }
  0x4b   :  { %480 = vmatprep.subr.mxu0 %v521_v0 }
  0x4c   :  { %481 = vmatpush3.msra.mxu0 %v75_v15 }
  0x4d   :  { %482 = vmatprep.subr.mxu0 %v521_v0 }
  0x4e   :  { %483 = vmatpush3.msra.mxu0 %v74_v16 }
  0xee   :  { %v380_v6 = vpop.f32.mrf.mxu0 }
  0xf0   :  { %v381_v8 = vpop.f32.mrf.mxu0 }
  0xf1   :  { %v382_v9 = vadd.f32 %v381_v8, %v380_v6 }
  0xf3   :  { %v169_v10 = vadd.f32 %v382_v9, %v90_v7 }
  0xf5   :  { %v172_v11 = vmul.f32 0.01, %v169_v10 }
  0xf7   :  { %v173_v12 = vmax.f32 %v169_v10, %v172_v11 }
  0xf9   :  { %450 = vmatmul.mubr.f32.vlgmr.msra.gmra.mxu1 %v173_v12 }
 0x1b9   :  { %v243_v18 = vpop.f32.mrf.mxu1 }
 0x1ba   :  { %v244_v19 = vadd.f32 %v243_v18, %v175_v17 }
 0x1bb   :  { %v451_v20 = vpop.f32.mrf.mxu1 }
 0x1bc   :  { %v247_v21 = vmul.f32 0.01, %v244_v19 }
 0x1be   :  { %v248_v22 = vmax.f32 %v244_v19, %v247_v21 }
 0x1c0   :  { %485 = vmatmul.mubr.f32.vlgmr.msra.gmra.mxu0 %v248_v22 }
 0x280   :  { %v317_v25 = vpop.f32.mrf.mxu0 }
 0x281   :  { %v318_v26 = vadd.f32 %v317_v25, %v249_v24 }
 0x282   :  { %v486_v27 = vpop.f32.mrf.mxu0 }
 0x283   :  { %v326_v0 = vsel %vm325_vm3, %v318_v26, -inf }
 0x284   :  { %v328_v28 = vsel %vm327_vm4, %v326_v0, -inf }
 0x285   :  { %329 = vmax.xlane.f32.xlu0 %v328_v28 }
 0x30e   :  { %v330_v29 = vpop.xlane.xlu0 %329 }
 0x30f   :  { %v331_v30 = vsub.f32 %v326_v0, %v330_v29 }
 0x311   :  { %v332_v31 = vmul.f32 1.442695, %v331_v30 }
 0x313   :  { %492 = vpow2.f32 %v332_v31 }
 0x320   :  { %v493_v32 = vpop.eup %492 }
 0x321   :  { %v334_v33 = vsel %vm325_vm3, %v493_v32, 0.0 }
 0x322   :  { %v335_v34 = vsel %vm327_vm4, %v334_v33, 0.0 }
 0x323   :  { %336 = vadd.xlane.f32.xlu0 %v335_v34 }
 0x3ac   :  { %v337_v1 = vpop.xlane.xlu0 %336 }
 0x3ad   :  { %494 = vrcp.f32 %v337_v1 }
 0x3ba   :  { %v495_v35 = vpop.eup %494 }
 0x3bb   :  { %v339_v36 = vmul.f32 %v495_v35, %v334_v33 }
 0x3bd   :  { %v341_v37 = vsel %vm340_vm5, %v318_v26, %v339_v36 }
 0x3be   :  { %342 = vst [vmem:[%s593_s2] sm:$0x1] %v341_v37 }
 0x3bf   :  { %347 = vsyncpa [#allocation3], 1 }

</bundles_post_ra>
